<compile_context>
chip_gen: v5e
topology: v5e:2x2
jax: 0.10.0
libtpu: 0.0.40
codegen_flags: <defaults>
</compile_context>

<pallas_src>
import jax
import jax.numpy as jnp
from jax.experimental import pallas as pl
from jax.experimental.pallas import tpu as pltpu

BN_EPS = 1e-5
LANE = 128
VMEM_LIMIT_BYTES = 48 * 1024 * 1024   # safe on v5e/v6e/v7x; re-derive per chip for big tiles


def _round_up(x, m):
    return (x + m - 1) // m * m


# --------------------------------------------------------------------------
# Kernel 1: fused 2x2 maxpool + 3x3 conv (tap-wise MXU matmuls) + BN partial
# stats. Grid over batch N; stats output block is resident (accumulator).
# --------------------------------------------------------------------------
def _make_pool_conv_stats_kernel(Hp, Wp, Cin, Cp, cdt):
    Mimg = Hp * Wp

    def kernel(x_ref, w_ref, y_ref, stats_ref, pad_ref):
        n = pl.program_id(0)

        @pl.when(n == 0)
        def _init():
            stats_ref[...] = jnp.zeros_like(stats_ref)
            pad_ref[...] = jnp.zeros_like(pad_ref)   # borders stay zero afterwards

        # Fused 2x2 max pool. x block is (1, Hp, 2, Wp, 2*Cin): the H pair sits
        # on its own axis, the W pair is merged into the lane dim (free bitcast
        # on the host), so pooling is an elementwise max + a lane split.
        v = x_ref[0]                                          # (Hp, 2, Wp, 2*Cin)
        hv = jnp.maximum(v[:, 0], v[:, 1])                    # pool H  -> (Hp, Wp, 2*Cin)
        pooled = jnp.maximum(hv[:, :, :Cin], hv[:, :, Cin:])  # pool W  -> (Hp, Wp, Cin)

        # Write pooled image into the interior of the zero-padded scratch.
        pad_ref[1:Hp + 1, 1:Wp + 1, :] = pooled

        # 3x3 conv as 9 accumulated tap matmuls (MXU), f32 accumulation.
        acc = jnp.zeros((Mimg, Cp), jnp.float32)
        for t in range(9):
            dy, dx = t // 3, t % 3
            tap = pad_ref[dy:dy + Hp, dx:dx + Wp, :]          # (Hp, Wp, Cin)
            acc = acc + jnp.dot(tap.reshape(Mimg, Cin).astype(cdt), w_ref[t],
                                preferred_element_type=jnp.float32)

        y_ref[0] = acc.astype(y_ref.dtype)

        # Per-channel partial BN stats accumulated across the batch grid axis.
        stats_ref[...] += jnp.concatenate(
            [jnp.sum(acc, axis=0, keepdims=True),
             jnp.sum(acc * acc, axis=0, keepdims=True)], axis=0)

    return kernel


# --------------------------------------------------------------------------
# Kernel 2: fused BN-normalize + ReLU (f32 epilogue) + 3x3 conv + BN partial
# stats for the second convolution_layer.
# --------------------------------------------------------------------------
def _make_bnrelu_conv_stats_kernel(Hp, Wp, Cp_in, Cp_out, cdt):
    Mimg = Hp * Wp

    def kernel(y_ref, scale_ref, shift_ref, w_ref, o_ref, stats_ref, pad_ref):
        n = pl.program_id(0)

        @pl.when(n == 0)
        def _init():
            stats_ref[...] = jnp.zeros_like(stats_ref)
            pad_ref[...] = jnp.zeros_like(pad_ref)

        # BN with precomputed per-channel scale/shift (computed once, outside
        # the per-tile loop) + ReLU, all in f32.
        a = jnp.maximum(y_ref[0] * scale_ref[...] + shift_ref[...], 0.0)   # (Hp, Wp, Cp_in)
        pad_ref[1:Hp + 1, 1:Wp + 1, :] = a

        acc = jnp.zeros((Mimg, Cp_out), jnp.float32)
        for t in range(9):
            dy, dx = t // 3, t % 3
            tap = pad_ref[dy:dy + Hp, dx:dx + Wp, :]
            acc = acc + jnp.dot(tap.reshape(Mimg, Cp_in).astype(cdt), w_ref[t],
                                preferred_element_type=jnp.float32)

        o_ref[0] = acc.astype(o_ref.dtype)
        stats_ref[...] += jnp.concatenate(
            [jnp.sum(acc, axis=0, keepdims=True),
             jnp.sum(acc * acc, axis=0, keepdims=True)], axis=0)

    return kernel


# --------------------------------------------------------------------------
# Kernel 3: BN-normalize + ReLU (pure elementwise, 'parallel' grid).
# --------------------------------------------------------------------------
def _bn_relu_kernel(y_ref, scale_ref, shift_ref, o_ref):
    o_ref[0] = jnp.maximum(y_ref[0] * scale_ref[...] + shift_ref[...],
                           0.0).astype(o_ref.dtype)


# --------------------------------------------------------------------------
# pallas_call wrappers
# --------------------------------------------------------------------------
def _pool_conv_call(x5, w1p, N, Hp, Wp, Cin, Cp, cdt):
    Mimg = Hp * Wp
    kernel = _make_pool_conv_stats_kernel(Hp, Wp, Cin, Cp, cdt)
    flops = 2 * N * Mimg * 9 * Cin * Cp
    bytes_acc = int(x5.size * x5.dtype.itemsize + w1p.size * w1p.dtype.itemsize
                    + N * Mimg * Cp * 4 + 2 * Cp * 4)
    return pl.pallas_call(
        kernel,
        out_shape=(jax.ShapeDtypeStruct((N, Mimg, Cp), jnp.float32),
                   jax.ShapeDtypeStruct((2, Cp), jnp.float32)),
        grid=(N,),
        in_specs=[
            pl.BlockSpec((1, Hp, 2, Wp, 2 * Cin), lambda n: (n, 0, 0, 0, 0)),
            pl.BlockSpec((9, Cin, Cp), lambda n: (0, 0, 0)),
        ],
        out_specs=(
            pl.BlockSpec((1, Mimg, Cp), lambda n: (n, 0, 0)),
            pl.BlockSpec((2, Cp), lambda n: (0, 0)),          # resident accumulator
        ),
        scratch_shapes=[pltpu.VMEM((Hp + 2, Wp + 2, Cin), jnp.float32)],
        compiler_params=pltpu.CompilerParams(
            dimension_semantics=("arbitrary",),               # stats reduce over batch
            vmem_limit_bytes=VMEM_LIMIT_BYTES),
        cost_estimate=pl.CostEstimate(flops=flops, transcendentals=0,
                                      bytes_accessed=bytes_acc),
    )(x5, w1p)


def _bnrelu_conv_call(y1r, scale1, shift1, w2p, N, Hp, Wp, Cp, cdt):
    Mimg = Hp * Wp
    kernel = _make_bnrelu_conv_stats_kernel(Hp, Wp, Cp, Cp, cdt)
    flops = 2 * N * Mimg * 9 * Cp * Cp
    bytes_acc = int(y1r.size * 4 + w2p.size * w2p.dtype.itemsize
                    + N * Mimg * Cp * 4 + 2 * Cp * 4)
    return pl.pallas_call(
        kernel,
        out_shape=(jax.ShapeDtypeStruct((N, Mimg, Cp), jnp.float32),
                   jax.ShapeDtypeStruct((2, Cp), jnp.float32)),
        grid=(N,),
        in_specs=[
            pl.BlockSpec((1, Hp, Wp, Cp), lambda n: (n, 0, 0, 0)),
            pl.BlockSpec((1, Cp), lambda n: (0, 0)),
            pl.BlockSpec((1, Cp), lambda n: (0, 0)),
            pl.BlockSpec((9, Cp, Cp), lambda n: (0, 0, 0)),
        ],
        out_specs=(
            pl.BlockSpec((1, Mimg, Cp), lambda n: (n, 0, 0)),
            pl.BlockSpec((2, Cp), lambda n: (0, 0)),
        ),
        scratch_shapes=[pltpu.VMEM((Hp + 2, Wp + 2, Cp), jnp.float32)],
        compiler_params=pltpu.CompilerParams(
            dimension_semantics=("arbitrary",),
            vmem_limit_bytes=VMEM_LIMIT_BYTES),
        cost_estimate=pl.CostEstimate(flops=flops, transcendentals=0,
                                      bytes_accessed=bytes_acc),
    )(y1r, scale1, shift1, w2p)


def _bn_relu_call(y2, scale2, shift2, out_dtype, N, Mimg, Cp):
    flops = 3 * N * Mimg * Cp
    bytes_acc = int(y2.size * 4 + N * Mimg * Cp * jnp.dtype(out_dtype).itemsize
                    + 2 * Cp * 4)
    return pl.pallas_call(
        _bn_relu_kernel,
        out_shape=jax.ShapeDtypeStruct((N, Mimg, Cp), out_dtype),
        grid=(N,),
        in_specs=[
            pl.BlockSpec((1, Mimg, Cp), lambda n: (n, 0, 0)),
            pl.BlockSpec((1, Cp), lambda n: (0, 0)),
            pl.BlockSpec((1, Cp), lambda n: (0, 0)),
        ],
        out_specs=pl.BlockSpec((1, Mimg, Cp), lambda n: (n, 0, 0)),
        compiler_params=pltpu.CompilerParams(
            dimension_semantics=("parallel",),                # elementwise: megacore-shard
            vmem_limit_bytes=VMEM_LIMIT_BYTES),
        cost_estimate=pl.CostEstimate(flops=flops, transcendentals=0,
                                      bytes_accessed=bytes_acc),
    )(y2, scale2, shift2)


# --------------------------------------------------------------------------
# BN batch-stat finalization: tiny (Cp,) vectors, computed once per channel
# outside the per-tile loops (then broadcast inside the kernels).
# --------------------------------------------------------------------------
def _bn_scale_shift(stats, gamma, beta, count, Cp):
    Cout = gamma.shape[0]
    gamma_p = jnp.pad(gamma.astype(jnp.float32), (0, Cp - Cout))
    beta_p = jnp.pad(beta.astype(jnp.float32), (0, Cp - Cout))
    mean = stats[0] / count
    var = jnp.maximum(stats[1] / count - mean * mean, 0.0)    # biased variance
    scale = gamma_p * jax.lax.rsqrt(var + BN_EPS)
    shift = beta_p - mean * scale
    return scale.reshape(1, Cp), shift.reshape(1, Cp)


# --------------------------------------------------------------------------
# downsample_layer forward (NCHW in / NCHW out, like the PyTorch module)
# --------------------------------------------------------------------------
def init_downsample_params(key, input_channels, output_channels, kernel_size=3):
    k1, k2 = jax.random.split(key)
    fan_in1 = input_channels * kernel_size * kernel_size
    fan_in2 = output_channels * kernel_size * kernel_size
    w1 = jax.random.uniform(k1, (kernel_size, kernel_size, input_channels, output_channels),
                            jnp.float32, -1.0, 1.0) / jnp.sqrt(float(fan_in1))
    w2 = jax.random.uniform(k2, (kernel_size, kernel_size, output_channels, output_channels),
                            jnp.float32, -1.0, 1.0) / jnp.sqrt(float(fan_in2))
    return {
        "w1": w1, "g1": jnp.ones((output_channels,), jnp.float32),
        "b1": jnp.zeros((output_channels,), jnp.float32),
        "w2": w2, "g2": jnp.ones((output_channels,), jnp.float32),
        "b2": jnp.zeros((output_channels,), jnp.float32),
    }


def downsample_layer_forward(x_nchw, params, compute_dtype=jnp.bfloat16):
    N, Cin, H, W = x_nchw.shape
    assert H % 2 == 0 and W % 2 == 0, "MaxPool2d(2): even H and W required"
    Hp, Wp = H // 2, W // 2
    Mimg = Hp * Wp
    Cout = params["w1"].shape[-1]
    Cp = _round_up(Cout, LANE)                # lane-dense channel padding
    cdt = jnp.dtype(compute_dtype)

    # NCHW -> NHWC, then a free bitcast reshape exposing the 2x2 pool window.
    x = jnp.transpose(x_nchw, (0, 2, 3, 1))
    x5 = x.reshape(N, Hp, 2, Wp, 2 * Cin)

    # Weights: pad Cout (and conv2's Cin) to Cp once, reshape (3,3,Ci,Cp)->(9,Ci,Cp),
    # pre-cast to the MXU compute dtype (outside any loop).
    w1p = jnp.pad(params["w1"], ((0, 0), (0, 0), (0, 0), (0, Cp - Cout))
                  ).reshape(9, Cin, Cp).astype(cdt)
    w2p = jnp.pad(params["w2"], ((0, 0), (0, 0), (0, Cp - Cout), (0, Cp - Cout))
                  ).reshape(9, Cp, Cp).astype(cdt)

    # Pass 1: fused maxpool + conv1 + BN1 partial stats.
    y1, stats1 = _pool_conv_call(x5, w1p, N, Hp, Wp, Cin, Cp, cdt)
    scale1, shift1 = _bn_scale_shift(stats1, params["g1"], params["b1"],
                                     float(N * Mimg), Cp)

    # Pass 2: fused BN1-normalize + ReLU + conv2 + BN2 partial stats.
    y1r = y1.reshape(N, Hp, Wp, Cp)           # free bitcast
    y2, stats2 = _bnrelu_conv_call(y1r, scale1, shift1, w2p, N, Hp, Wp, Cp, cdt)
    scale2, shift2 = _bn_scale_shift(stats2, params["g2"], params["b2"],
                                     float(N * Mimg), Cp)

    # Pass 3: BN2-normalize + ReLU.
    out = _bn_relu_call(y2, scale2, shift2, x_nchw.dtype, N, Mimg, Cp)

    out = out.reshape(N, Hp, Wp, Cp)[..., :Cout]       # strip lane padding
    return jnp.transpose(out, (0, 3, 1, 2))            # NHWC -> NCHW


# --------------------------------------------------------------------------
# Pure-JAX reference for a correctness cross-check
# --------------------------------------------------------------------------
def _ref_conv_bn_relu(x, w, gamma, beta):
    y = jax.lax.conv_general_dilated(
        x, w, window_strides=(1, 1), padding="SAME",
        dimension_numbers=("NHWC", "HWIO", "NHWC"))
    mean = jnp.mean(y, axis=(0, 1, 2), keepdims=True)
    var = jnp.mean((y - mean) ** 2, axis=(0, 1, 2), keepdims=True)
    y = (y - mean) * jax.lax.rsqrt(var + BN_EPS) * gamma + beta
    return jnp.maximum(y, 0.0)


def _ref_forward(x_nchw, params):
    x = jnp.transpose(x_nchw, (0, 2, 3, 1))
    x = jax.lax.reduce_window(x, -jnp.inf, jax.lax.max,
                              (1, 2, 2, 1), (1, 2, 2, 1), "VALID")
    x = _ref_conv_bn_relu(x, params["w1"], params["g1"], params["b1"])
    x = _ref_conv_bn_relu(x, params["w2"], params["g2"], params["b2"])
    return jnp.transpose(x, (0, 3, 1, 2))


if __name__ == "__main__":
    key = jax.random.PRNGKey(0)
    kx, kp = jax.random.split(key)

    N, Cin, H, W = 2, 4, 16, 16
    Cout = 8
    x = jax.random.normal(kx, (N, Cin, H, W), dtype=jnp.float32)
    params = init_downsample_params(kp, Cin, Cout)

    ref = jax.block_until_ready(_ref_forward(x, params))

    # Strict check: f32 MXU path vs pure-JAX reference.
    out_f32 = jax.block_until_ready(
        downsample_layer_forward(x, params, compute_dtype=jnp.float32))
    assert out_f32.shape == (N, Cout, H // 2, W // 2), out_f32.shape
    assert jnp.allclose(out_f32, ref, rtol=1e-3, atol=1e-3), \
        float(jnp.max(jnp.abs(out_f32 - ref)))

    # Production path: bf16-fed MXU with f32 accumulation (loose check).
    out_bf = jax.block_until_ready(downsample_layer_forward(x, params))
    assert out_bf.shape == (N, Cout, H // 2, W // 2), out_bf.shape
    assert bool(jnp.all(jnp.isfinite(out_bf)))
    assert jnp.allclose(out_bf, ref, rtol=1e-1, atol=1e-1), \
        float(jnp.max(jnp.abs(out_bf - ref)))

    print("KERNEL_OK")
</pallas_src>

<mosaic_0001>
module attributes {stable_mosaic.version = 11 : i64} {
  func.func @kernel(%arg0: i32, %arg1: memref<1x8x2x8x8xf32, #tpu.memory_space<vmem>>, %arg2: memref<9x4x128xf32, #tpu.memory_space<vmem>>, %arg3: memref<1x64x128xf32, #tpu.memory_space<vmem>>, %arg4: memref<2x128xf32, #tpu.memory_space<vmem>>, %arg5: memref<10x10x4xf32, #tpu.memory_space<vmem>>) attributes {dimension_semantics = [#tpu.dimension_semantics<arbitrary>], iteration_bounds = array<i64: 2>, scalar_prefetch = 0 : i64, scratch_operands = 1 : i64, tpu.core_type = #tpu.core_type<tc>, window_params = [{transform_indices = @transform_0, window_bounds = array<i64: 1, 8, 2, 8, 8>}, {pipeline_mode = #tpu.pipeline_mode<synchronous>, transform_indices = @transform_1, window_bounds = array<i64: 9, 4, 128>}, {transform_indices = @transform_2, window_bounds = array<i64: 1, 64, 128>}, {pipeline_mode = #tpu.pipeline_mode<synchronous>, transform_indices = @transform_3, window_bounds = array<i64: 2, 128>}]} {
    %c0_i32 = arith.constant 0 : i32
    %0 = arith.cmpi eq, %arg0, %c0_i32 : i32
    %1 = arith.extui %0 : i1 to i32
    %c0_i32_0 = arith.constant 0 : i32
    %2 = arith.cmpi ne, %1, %c0_i32_0 : i32
    scf.if %2 {
      %cst_72 = arith.constant 0.000000e+00 : f32
      %81 = vector.broadcast %cst_72 : f32 to vector<2x128xf32>
      %c0_73 = arith.constant 0 : index
      %c0_74 = arith.constant 0 : index
      %82 = vector.load %arg4[%c0_73, %c0_74] : memref<2x128xf32, #tpu.memory_space<vmem>>, vector<2x128xf32>
      tpu.vector_store %arg4[%c0_73, %c0_74], %81 {strides = array<i32>} : memref<2x128xf32, #tpu.memory_space<vmem>>, vector<2x128xf32>,
      %cst_75 = arith.constant 0.000000e+00 : f32
      %83 = vector.broadcast %cst_75 : f32 to vector<10x10x4xf32>
      %c0_76 = arith.constant 0 : index
      %c0_77 = arith.constant 0 : index
      %c0_78 = arith.constant 0 : index
      %84 = vector.load %arg5[%c0_76, %c0_77, %c0_78] : memref<10x10x4xf32, #tpu.memory_space<vmem>>, vector<10x10x4xf32>
      tpu.vector_store %arg5[%c0_76, %c0_77, %c0_78], %83 {strides = array<i32>} : memref<10x10x4xf32, #tpu.memory_space<vmem>>, vector<10x10x4xf32>,
    } else {
    }
    %c0 = arith.constant 0 : index
    %c0_1 = arith.constant 0 : index
    %c0_2 = arith.constant 0 : index
    %c0_3 = arith.constant 0 : index
    %c0_4 = arith.constant 0 : index
    %3 = vector.load %arg1[%c0, %c0_1, %c0_2, %c0_3, %c0_4] : memref<1x8x2x8x8xf32, #tpu.memory_space<vmem>>, vector<1x8x2x8x8xf32>
    %4 = vector.shape_cast %3 : vector<1x8x2x8x8xf32> to vector<8x2x8x8xf32>
    %5 = vector.extract_strided_slice %4 {offsets = [0, 0, 0, 0], sizes = [8, 1, 8, 8], strides = [1, 1, 1, 1]} : vector<8x2x8x8xf32> to vector<8x1x8x8xf32>
    %6 = vector.shape_cast %5 : vector<8x1x8x8xf32> to vector<8x8x8xf32>
    %7 = vector.extract_strided_slice %4 {offsets = [0, 1, 0, 0], sizes = [8, 1, 8, 8], strides = [1, 1, 1, 1]} : vector<8x2x8x8xf32> to vector<8x1x8x8xf32>
    %8 = vector.shape_cast %7 : vector<8x1x8x8xf32> to vector<8x8x8xf32>
    %9 = arith.maximumf %6, %8 : vector<8x8x8xf32>
    %10 = vector.extract_strided_slice %9 {offsets = [0, 0, 0], sizes = [8, 8, 4], strides = [1, 1, 1]} : vector<8x8x8xf32> to vector<8x8x4xf32>
    %11 = vector.extract_strided_slice %9 {offsets = [0, 0, 4], sizes = [8, 8, 4], strides = [1, 1, 1]} : vector<8x8x8xf32> to vector<8x8x4xf32>
    %12 = arith.maximumf %10, %11 : vector<8x8x4xf32>
    %c1 = arith.constant 1 : index
    %c1_5 = arith.constant 1 : index
    %c0_6 = arith.constant 0 : index
    %13 = vector.load %arg5[%c1, %c1_5, %c0_6] : memref<10x10x4xf32, #tpu.memory_space<vmem>>, vector<8x8x4xf32>
    tpu.vector_store %arg5[%c1, %c1_5, %c0_6], %12 {strides = array<i32>} : memref<10x10x4xf32, #tpu.memory_space<vmem>>, vector<8x8x4xf32>,
    %cst = arith.constant 0.000000e+00 : f32
    %14 = vector.broadcast %cst : f32 to vector<64x128xf32>
    %c0_7 = arith.constant 0 : index
    %c0_8 = arith.constant 0 : index
    %c0_9 = arith.constant 0 : index
    %15 = vector.load %arg5[%c0_7, %c0_8, %c0_9] : memref<10x10x4xf32, #tpu.memory_space<vmem>>, vector<8x8x4xf32>
    %16 = vector.shape_cast %15 : vector<8x8x4xf32> to vector<64x4xf32>
    %c0_10 = arith.constant 0 : index
    %c0_11 = arith.constant 0 : index
    %c0_12 = arith.constant 0 : index
    %17 = vector.load %arg2[%c0_10, %c0_11, %c0_12] : memref<9x4x128xf32, #tpu.memory_space<vmem>>, vector<1x4x128xf32>
    %18 = vector.shape_cast %17 : vector<1x4x128xf32> to vector<4x128xf32>
    %cst_13 = arith.constant dense<0.000000e+00> : vector<64x128xf32>
    %19 = tpu.matmul %16, %18, %cst_13 {dimension_numbers = #tpu.dot_dimension_numbers<[1], [0], [0], [1], [0, 0, 1, 1], [], []>} : vector<64x4xf32>, vector<4x128xf32>, vector<64x128xf32> -> vector<64x128xf32>
    %20 = arith.addf %14, %19 : vector<64x128xf32>
    %c0_14 = arith.constant 0 : index
    %c1_15 = arith.constant 1 : index
    %c0_16 = arith.constant 0 : index
    %21 = vector.load %arg5[%c0_14, %c1_15, %c0_16] : memref<10x10x4xf32, #tpu.memory_space<vmem>>, vector<8x8x4xf32>
    %22 = vector.shape_cast %21 : vector<8x8x4xf32> to vector<64x4xf32>
    %c1_17 = arith.constant 1 : index
    %c0_18 = arith.constant 0 : index
    %c0_19 = arith.constant 0 : index
    %23 = vector.load %arg2[%c1_17, %c0_18, %c0_19] : memref<9x4x128xf32, #tpu.memory_space<vmem>>, vector<1x4x128xf32>
    %24 = vector.shape_cast %23 : vector<1x4x128xf32> to vector<4x128xf32>
    %cst_20 = arith.constant dense<0.000000e+00> : vector<64x128xf32>
    %25 = tpu.matmul %22, %24, %cst_20 {dimension_numbers = #tpu.dot_dimension_numbers<[1], [0], [0], [1], [0, 0, 1, 1], [], []>} : vector<64x4xf32>, vector<4x128xf32>, vector<64x128xf32> -> vector<64x128xf32>
    %26 = arith.addf %20, %25 : vector<64x128xf32>
    %c0_21 = arith.constant 0 : index
    %c2 = arith.constant 2 : index
    %c0_22 = arith.constant 0 : index
    %27 = vector.load %arg5[%c0_21, %c2, %c0_22] : memref<10x10x4xf32, #tpu.memory_space<vmem>>, vector<8x8x4xf32>
    %28 = vector.shape_cast %27 : vector<8x8x4xf32> to vector<64x4xf32>
    %c2_23 = arith.constant 2 : index
    %c0_24 = arith.constant 0 : index
    %c0_25 = arith.constant 0 : index
    %29 = vector.load %arg2[%c2_23, %c0_24, %c0_25] : memref<9x4x128xf32, #tpu.memory_space<vmem>>, vector<1x4x128xf32>
    %30 = vector.shape_cast %29 : vector<1x4x128xf32> to vector<4x128xf32>
    %cst_26 = arith.constant dense<0.000000e+00> : vector<64x128xf32>
    %31 = tpu.matmul %28, %30, %cst_26 {dimension_numbers = #tpu.dot_dimension_numbers<[1], [0], [0], [1], [0, 0, 1, 1], [], []>} : vector<64x4xf32>, vector<4x128xf32>, vector<64x128xf32> -> vector<64x128xf32>
    %32 = arith.addf %26, %31 : vector<64x128xf32>
    %c1_27 = arith.constant 1 : index
    %c0_28 = arith.constant 0 : index
    %c0_29 = arith.constant 0 : index
    %33 = vector.load %arg5[%c1_27, %c0_28, %c0_29] : memref<10x10x4xf32, #tpu.memory_space<vmem>>, vector<8x8x4xf32>
    %34 = vector.shape_cast %33 : vector<8x8x4xf32> to vector<64x4xf32>
    %c3 = arith.constant 3 : index
    %c0_30 = arith.constant 0 : index
    %c0_31 = arith.constant 0 : index
    %35 = vector.load %arg2[%c3, %c0_30, %c0_31] : memref<9x4x128xf32, #tpu.memory_space<vmem>>, vector<1x4x128xf32>
    %36 = vector.shape_cast %35 : vector<1x4x128xf32> to vector<4x128xf32>
    %cst_32 = arith.constant dense<0.000000e+00> : vector<64x128xf32>
    %37 = tpu.matmul %34, %36, %cst_32 {dimension_numbers = #tpu.dot_dimension_numbers<[1], [0], [0], [1], [0, 0, 1, 1], [], []>} : vector<64x4xf32>, vector<4x128xf32>, vector<64x128xf32> -> vector<64x128xf32>
    %38 = arith.addf %32, %37 : vector<64x128xf32>
    %c1_33 = arith.constant 1 : index
    %c1_34 = arith.constant 1 : index
    %c0_35 = arith.constant 0 : index
    %39 = vector.load %arg5[%c1_33, %c1_34, %c0_35] : memref<10x10x4xf32, #tpu.memory_space<vmem>>, vector<8x8x4xf32>
    %40 = vector.shape_cast %39 : vector<8x8x4xf32> to vector<64x4xf32>
    %c4 = arith.constant 4 : index
    %c0_36 = arith.constant 0 : index
    %c0_37 = arith.constant 0 : index
    %41 = vector.load %arg2[%c4, %c0_36, %c0_37] : memref<9x4x128xf32, #tpu.memory_space<vmem>>, vector<1x4x128xf32>
    %42 = vector.shape_cast %41 : vector<1x4x128xf32> to vector<4x128xf32>
    %cst_38 = arith.constant dense<0.000000e+00> : vector<64x128xf32>
    %43 = tpu.matmul %40, %42, %cst_38 {dimension_numbers = #tpu.dot_dimension_numbers<[1], [0], [0], [1], [0, 0, 1, 1], [], []>} : vector<64x4xf32>, vector<4x128xf32>, vector<64x128xf32> -> vector<64x128xf32>
    %44 = arith.addf %38, %43 : vector<64x128xf32>
    %c1_39 = arith.constant 1 : index
    %c2_40 = arith.constant 2 : index
    %c0_41 = arith.constant 0 : index
    %45 = vector.load %arg5[%c1_39, %c2_40, %c0_41] : memref<10x10x4xf32, #tpu.memory_space<vmem>>, vector<8x8x4xf32>
    %46 = vector.shape_cast %45 : vector<8x8x4xf32> to vector<64x4xf32>
    %c5 = arith.constant 5 : index
    %c0_42 = arith.constant 0 : index
    %c0_43 = arith.constant 0 : index
    %47 = vector.load %arg2[%c5, %c0_42, %c0_43] : memref<9x4x128xf32, #tpu.memory_space<vmem>>, vector<1x4x128xf32>
    %48 = vector.shape_cast %47 : vector<1x4x128xf32> to vector<4x128xf32>
    %cst_44 = arith.constant dense<0.000000e+00> : vector<64x128xf32>
    %49 = tpu.matmul %46, %48, %cst_44 {dimension_numbers = #tpu.dot_dimension_numbers<[1], [0], [0], [1], [0, 0, 1, 1], [], []>} : vector<64x4xf32>, vector<4x128xf32>, vector<64x128xf32> -> vector<64x128xf32>
    %50 = arith.addf %44, %49 : vector<64x128xf32>
    %c2_45 = arith.constant 2 : index
    %c0_46 = arith.constant 0 : index
    %c0_47 = arith.constant 0 : index
    %51 = vector.load %arg5[%c2_45, %c0_46, %c0_47] : memref<10x10x4xf32, #tpu.memory_space<vmem>>, vector<8x8x4xf32>
    %52 = vector.shape_cast %51 : vector<8x8x4xf32> to vector<64x4xf32>
    %c6 = arith.constant 6 : index
    %c0_48 = arith.constant 0 : index
    %c0_49 = arith.constant 0 : index
    %53 = vector.load %arg2[%c6, %c0_48, %c0_49] : memref<9x4x128xf32, #tpu.memory_space<vmem>>, vector<1x4x128xf32>
    %54 = vector.shape_cast %53 : vector<1x4x128xf32> to vector<4x128xf32>
    %cst_50 = arith.constant dense<0.000000e+00> : vector<64x128xf32>
    %55 = tpu.matmul %52, %54, %cst_50 {dimension_numbers = #tpu.dot_dimension_numbers<[1], [0], [0], [1], [0, 0, 1, 1], [], []>} : vector<64x4xf32>, vector<4x128xf32>, vector<64x128xf32> -> vector<64x128xf32>
    %56 = arith.addf %50, %55 : vector<64x128xf32>
    %c2_51 = arith.constant 2 : index
    %c1_52 = arith.constant 1 : index
    %c0_53 = arith.constant 0 : index
    %57 = vector.load %arg5[%c2_51, %c1_52, %c0_53] : memref<10x10x4xf32, #tpu.memory_space<vmem>>, vector<8x8x4xf32>
    %58 = vector.shape_cast %57 : vector<8x8x4xf32> to vector<64x4xf32>
    %c7 = arith.constant 7 : index
    %c0_54 = arith.constant 0 : index
    %c0_55 = arith.constant 0 : index
    %59 = vector.load %arg2[%c7, %c0_54, %c0_55] : memref<9x4x128xf32, #tpu.memory_space<vmem>>, vector<1x4x128xf32>
    %60 = vector.shape_cast %59 : vector<1x4x128xf32> to vector<4x128xf32>
    %cst_56 = arith.constant dense<0.000000e+00> : vector<64x128xf32>
    %61 = tpu.matmul %58, %60, %cst_56 {dimension_numbers = #tpu.dot_dimension_numbers<[1], [0], [0], [1], [0, 0, 1, 1], [], []>} : vector<64x4xf32>, vector<4x128xf32>, vector<64x128xf32> -> vector<64x128xf32>
    %62 = arith.addf %56, %61 : vector<64x128xf32>
    %c2_57 = arith.constant 2 : index
    %c2_58 = arith.constant 2 : index
    %c0_59 = arith.constant 0 : index
    %63 = vector.load %arg5[%c2_57, %c2_58, %c0_59] : memref<10x10x4xf32, #tpu.memory_space<vmem>>, vector<8x8x4xf32>
    %64 = vector.shape_cast %63 : vector<8x8x4xf32> to vector<64x4xf32>
    %c8 = arith.constant 8 : index
    %c0_60 = arith.constant 0 : index
    %c0_61 = arith.constant 0 : index
    %65 = vector.load %arg2[%c8, %c0_60, %c0_61] : memref<9x4x128xf32, #tpu.memory_space<vmem>>, vector<1x4x128xf32>
    %66 = vector.shape_cast %65 : vector<1x4x128xf32> to vector<4x128xf32>
    %cst_62 = arith.constant dense<0.000000e+00> : vector<64x128xf32>
    %67 = tpu.matmul %64, %66, %cst_62 {dimension_numbers = #tpu.dot_dimension_numbers<[1], [0], [0], [1], [0, 0, 1, 1], [], []>} : vector<64x4xf32>, vector<4x128xf32>, vector<64x128xf32> -> vector<64x128xf32>
    %68 = arith.addf %62, %67 : vector<64x128xf32>
    %c0_63 = arith.constant 0 : index
    %c0_64 = arith.constant 0 : index
    %c0_65 = arith.constant 0 : index
    %69 = vector.load %arg3[%c0_63, %c0_64, %c0_65] : memref<1x64x128xf32, #tpu.memory_space<vmem>>, vector<1x64x128xf32>
    %70 = vector.shape_cast %69 : vector<1x64x128xf32> to vector<64x128xf32>
    %71 = vector.shape_cast %68 : vector<64x128xf32> to vector<1x64x128xf32>
    tpu.vector_store %arg3[%c0_63, %c0_64, %c0_65], %71 {strides = array<i32>} : memref<1x64x128xf32, #tpu.memory_space<vmem>>, vector<1x64x128xf32>,
    %c0_66 = arith.constant 0 : index
    %c0_67 = arith.constant 0 : index
    %72 = vector.load %arg4[%c0_66, %c0_67] : memref<2x128xf32, #tpu.memory_space<vmem>>, vector<2x128xf32>
    %cst_68 = arith.constant dense<0.000000e+00> : vector<128xf32>
    %73 = vector.multi_reduction <add>, %68, %cst_68 [0] : vector<64x128xf32> to vector<128xf32>
    %74 = vector.shape_cast %73 : vector<128xf32> to vector<1x128xf32>
    %75 = arith.mulf %68, %68 : vector<64x128xf32>
    %cst_69 = arith.constant dense<0.000000e+00> : vector<128xf32>
    %76 = vector.multi_reduction <add>, %75, %cst_69 [0] : vector<64x128xf32> to vector<128xf32>
    %77 = vector.shape_cast %76 : vector<128xf32> to vector<1x128xf32>
    %78 = tpu.concatenate %74, %77 in 0 : vector<1x128xf32>, vector<1x128xf32> -> vector<2x128xf32>
    %79 = arith.addf %72, %78 : vector<2x128xf32>
    %c0_70 = arith.constant 0 : index
    %c0_71 = arith.constant 0 : index
    %80 = vector.load %arg4[%c0_70, %c0_71] : memref<2x128xf32, #tpu.memory_space<vmem>>, vector<2x128xf32>
    tpu.vector_store %arg4[%c0_70, %c0_71], %79 {strides = array<i32>} : memref<2x128xf32, #tpu.memory_space<vmem>>, vector<2x128xf32>,
    return
  }
  func.func @transform_0(%arg0: i32) -> (i32, i32, i32, i32, i32) {
    %c0_i32 = arith.constant 0 : i32
    %c0_i32_0 = arith.constant 0 : i32
    %c0_i32_1 = arith.constant 0 : i32
    %c0_i32_2 = arith.constant 0 : i32
    %c0_i32_3 = arith.constant 0 : i32
    return %arg0, %c0_i32, %c0_i32_0, %c0_i32_1, %c0_i32_2 : i32, i32, i32, i32, i32
  }
  func.func @transform_1(%arg0: i32) -> (i32, i32, i32) {
    %c0_i32 = arith.constant 0 : i32
    %c0_i32_0 = arith.constant 0 : i32
    %c0_i32_1 = arith.constant 0 : i32
    %c0_i32_2 = arith.constant 0 : i32
    return %c0_i32, %c0_i32_0, %c0_i32_1 : i32, i32, i32
  }
  func.func @transform_2(%arg0: i32) -> (i32, i32, i32) {
    %c0_i32 = arith.constant 0 : i32
    %c0_i32_0 = arith.constant 0 : i32
    %c0_i32_1 = arith.constant 0 : i32
    return %arg0, %c0_i32, %c0_i32_0 : i32, i32, i32
  }
  func.func @transform_3(%arg0: i32) -> (i32, i32) {
    %c0_i32 = arith.constant 0 : i32
    %c0_i32_0 = arith.constant 0 : i32
    %c0_i32_1 = arith.constant 0 : i32
    return %c0_i32, %c0_i32_0 : i32, i32
  }
}

</mosaic_0001>

<bundles_post_ra>
// kernel: tpu_custom_call.1
= control target key start
LH: loop header
LB: loop body
LE: loop exit
PB: predicated region body
PF: predicated region fallthrough
CT: control target
= control target key end

     0   :  { %9 = vsyncpa [#allocation4], 0  ;;  %s1985_s0 = inlined_call_operand.hbm [shape: f32[2,8,2,8,8], index: 0, kind: input, shape index: {}]   ;;  %s1986_s1 = inlined_call_operand.hbm [shape: f32[9,4,128], index: 1, kind: input, shape index: {}]   ;;  %s1987_s2 = inlined_call_operand.hbm [shape: f32[2,64,128], index: 2, kind: output, shape index: {0}]   ;;  %s1988_s3 = inlined_call_operand.hbm [shape: f32[2,128], index: 3, kind: output, shape index: {1}]  }
   0x1   :  { %11 = vsyncpa [#allocation4 + $0x1], 0 }
   0x2   :  { %12 = vsyncpa [#allocation7], 0 }
   0x3   :  { %13 = vsyncpa [#allocation5], 0 }
   0x4   :  { %15 = vsyncpa [#allocation5 + $0x1], 0 }
   0x5   :  { %16 = vsyncpa [#allocation10], 0  ;;  %s1608_s12 = smov 0   ;;  %s1610_s13 = smov 0  }
   0x6   :  { %s1612_s14 = smov 0   ;;  %s1614_s15 = smov 0  }
   0x7 LB: > { %s1629_s16 = sadd.s32 4294967295, %s1576_s15   ;;  %s1237_s17 = sadd.s32 4294967294, %s1576_s15   ;;  %s1576_s15 = sphi %s1614_s15, %s2003_s15   ;;  %s1572_s14 = sphi %s1612_s14, %s2002_s14   ;;  %s1568_s13 = sphi %s1610_s13, %s2001_s13   ;;  %s1564_s12 = sphi %s1608_s12, %s2000_s12  }
   0x8   : > { %p42_p0 = scmp.ne.s32.totalorder %s1568_s13, %s1564_s12  ;;  %p43_p1 = scmp.eq.s32.totalorder %s1629_s16, 0 }
   0x9   : > { %p1989_p2 = scmp.eq.s32.totalorder %s1629_s16, 1  ;;  %p93_p3 = scmp.eq.s32.totalorder %s1237_s17, 1 }
   0xa   : > { %p1638_p4 = por %p43_p1, %p42_p0  ;;  %p1238_p5 = scmp.ge.s32.totalorder %s1576_s15, 1 }
   0xb   : > { %p1643_p6 = por %p93_p3, %p42_p0  ;;  %p121_p7 = scmp.lt.s32.totalorder %s1576_s15, 3 }
   0xc   : > { %s132_s22 = sshll.u32 %s1986_s1, 4  ;;  %s1578_s24 = smov [#allocation6]   ;;  %s133_s22 = int_to_ptr.hbm [resolvable:$true] %s132_s22 }
   0xd   : > { %p1652_p9 = pnand %p1238_p5, %p121_p7  ;;  %s134_s25 = sshll.u32 %s1578_s24, 4  ;;  %s135_s25 = int_to_ptr.vmem [resolvable:$true] %s134_s25 }
   0xe   : > { %s1662_s26 = sadd.s32 1, %s1576_s15   ;;  %s1579_s27 = smov 64  }
   0xf   : > { %p1354_p10 = pneg %p1652_p9  ;;  %s1580_s28 = smov 4  }
  0x10   : > { %s26_s29 = ssub.s32 %s1576_s15, %s1662_s26  ;;  %s29_s30 = sadd.s32 1, %s1572_s14 }
  0x11   : > { %p1355_p11 = pnand %p1354_p10, %p43_p1  ;;  %p27_p13 = scmp.eq.s32.totalorder %s26_s29, 0 }
  0x12   : > { %p36_p0 = scmp.ne.s32.totalorder %s1572_s14, %s1568_s13  ;;  %p37_p3 = scmp.eq.s32.totalorder %s1576_s15, 0 }
  0x13   : > { %1357 = dma.hbm_to_vmem [thread:$0]  (!%p1355_p11), %s133_s22, 576, %s135_s25, [#allocation7], %s1579_s27, %s1579_s27, %s1580_s28  }
  0x14   : > { %p1367_p5 = scmp.lt.s32.totalorder %s1576_s15, 2  ;;  %p38_p7 = por %p37_p3, %p36_p0 }
  0x15   : > { %s1672_s4 = scalar_select %p27_p13, %s1572_s14, %s29_s30  }
  0x16   : > { %p1676_p10 = por %p1989_p2, %p36_p0  ;;  %s148_s6 = sand.u32 1, %s1572_s14  }
  0x17   : > { %s1337_s7 = sshll.u32 %s1576_s15, 7  ;;  %s1241_s8 = sshll.u32 %s148_s6, 7 }
  0x18   : > { %s157_s11 = scalar_lea.hbm %s1985_s0, %s1337_s7  ;;  %s152_s20 = scalar_lea.vmem [#allocation3], %s1241_s8 }
  0x19   : > { %s158_s17 = sshll.u32 %s157_s11, 4  ;;  %s160_s21 = sshll.u32 %s152_s20, 4  ;;  %s159_s17 = int_to_ptr.hbm [resolvable:$true] %s158_s17  ;;  %s161_s21 = int_to_ptr.vmem [resolvable:$true] %s160_s21 }
  0x1a   : > { %p1687_p11 = pnand %p1367_p5, %p38_p7  ;;  %s149_s24 = scalar_lea.sflag [#allocation4], %s148_s6 }
  0x1b   : > { %s1444_s25 = sshra.s32 %s159_s17, 4  ;;  %s1451_s30 = scalar_lea.hbm %s1985_s0, 256  ;;  %s1445_s25 = int_to_ptr.hbm [resolvable:$true] %s1444_s25 }
  0x1c   : > { %s1446_s27 = scalar_lea.hbm %s1445_s25, 128  ;;  %p1448_p0 = pneg %p1687_p11 }
  0x1d   : > { %p1447_p13 = scmp.ne.s32.totalorder %s1445_s25, %s1446_s27  ;;  %p1452_p5 = scmp.lt.s32.totalorder %s1445_s25, %s1985_s0 }
  0x1e   : > { %p1453_p7 = scmp.lt.s32.totalorder %s1451_s30, %s1446_s27 }
  0x1f   : > { %p1449_p3 = pnand %p1448_p0, %p1447_p13 }
  0x20   : > { %p1454_p2 = por %p1453_p7, %p1452_p5 }
  0x21   : > { %p1450_p12 = pneg %p1449_p3 }
  0x23   : > { %p1455_p8 = pnand %p1454_p2, %p1450_p12 }
  0x25   : > { %1458 = shalt.err (!%p1455_p8)
}
  0x26   : > { %s1581_s6 = smov 128   ;;  %s1582_s9 = smov 8  }
  0x27   : > { %1361 = dma.hbm_to_vmem [thread:$0]  (!%p1687_p11), %s159_s17, 2048, %s161_s21, %s149_s24, %s1581_s6, %s1581_s6, %s1582_s9  }
  0x28   : > { %172 = sbr.rel (%p1652_p9) target bundleno = 509 (0x1fd), region = 28  ;;  %s1704_s10 = sand.u32 (!%p1652_p9), 1, %s1568_s13  }
  0x29   : > { %s1245_s11 = sshll.u32 (!%p1652_p9), %s1704_s10, 7  ;;  %s175_s20 = scalar_lea.sflag (!%p1652_p9), [#allocation4], %s1704_s10 }
  0x2a   : > { %s1708_s25 = scalar_lea.vmem (!%p1652_p9), [#allocation3], %s1245_s11 }
  0x2d   : > { %1547 = dma.done.wait (%p1638_p4), %s175_s20, 2048  }
  0x2e   : > { %1549 = vsyncadd (%p1638_p4), %s175_s20, 4294965248 }
  0x2f   : > { %1551 = dma.done.wait (%p43_p1), [#allocation7], 576  }
  0x30   : > { %1553 = vsyncadd (%p43_p1), [#allocation7], 4294966720  ;;  %s1247_s23 = sshll.u32 %s1704_s10, 6  ;;  %p1995_p2 = scmp.ne.s32.totalorder %s1629_s16, 0 }
  0x31   : > { %s1719_s17 = scalar_lea.vmem [#allocation8], %s1247_s23 }
  0x32   : > { %210 = sbr.rel (%p1995_p2) target bundleno = 77 (0x4d), region = 40 }
  0x37   : > { %vm212_vm0 = vcmask 31744   ;;  %v1583_v0 = vmov 0.0   ;;  %vm214_vm1 = vcmask 25600  }
  0x38   : > { %211 = vst [vmem:[#allocation9] sm:$0x3] %v1583_v0 }
  0x39   : > { %213 = vst.msk [vmem:[#allocation2] sm:$0xff] %vm212_vm0, %v1583_v0 }
  0x3a   : > { %216 = vst.msk [vmem:[#allocation2 + $0x10] sm:$0xff] %vm212_vm0, %v1583_v0 }
  0x3b   : > { %218 = vst.msk [vmem:[#allocation2 + $0x20] sm:$0xff] %vm212_vm0, %v1583_v0 }
  0x3c   : > { %220 = vst.msk [vmem:[#allocation2 + $0x30] sm:$0xff] %vm212_vm0, %v1583_v0 }
  0x3d   : > { %222 = vst.msk [vmem:[#allocation2 + $0x40] sm:$0xff] %vm212_vm0, %v1583_v0 }
  0x3e   : > { %224 = vst.msk [vmem:[#allocation2 + $0x50] sm:$0xff] %vm212_vm0, %v1583_v0 }
  0x3f   : > { %226 = vst.msk [vmem:[#allocation2 + $0x60] sm:$0xff] %vm212_vm0, %v1583_v0 }
  0x40   : > { %228 = vst.msk [vmem:[#allocation2 + $0x70] sm:$0xff] %vm212_vm0, %v1583_v0 }
  0x41   : > { %230 = vst.msk [vmem:[#allocation2 + $0x80] sm:$0xff] %vm212_vm0, %v1583_v0 }
  0x42   : > { %232 = vst.msk [vmem:[#allocation2 + $0x90] sm:$0xff] %vm212_vm0, %v1583_v0 }
  0x43   : > { %215 = vst.msk [vmem:[#allocation2 + $0x8] sm:$0x3] %vm214_vm1, %v1583_v0 }
  0x44   : > { %217 = vst.msk [vmem:[#allocation2 + $0x18] sm:$0x3] %vm214_vm1, %v1583_v0 }
  0x45   : > { %219 = vst.msk [vmem:[#allocation2 + $0x28] sm:$0x3] %vm214_vm1, %v1583_v0 }
  0x46   : > { %221 = vst.msk [vmem:[#allocation2 + $0x38] sm:$0x3] %vm214_vm1, %v1583_v0 }
  0x47   : > { %223 = vst.msk [vmem:[#allocation2 + $0x48] sm:$0x3] %vm214_vm1, %v1583_v0 }
  0x48   : > { %225 = vst.msk [vmem:[#allocation2 + $0x58] sm:$0x3] %vm214_vm1, %v1583_v0 }
  0x49   : > { %227 = vst.msk [vmem:[#allocation2 + $0x68] sm:$0x3] %vm214_vm1, %v1583_v0 }
  0x4a   : > { %229 = vst.msk [vmem:[#allocation2 + $0x78] sm:$0x3] %vm214_vm1, %v1583_v0 }
  0x4b   : > { %231 = vst.msk [vmem:[#allocation2 + $0x88] sm:$0x3] %vm214_vm1, %v1583_v0 }
  0x4c   : > { %233 = vst.msk [vmem:[#allocation2 + $0x98] sm:$0x3] %vm214_vm1, %v1583_v0 }
  0x4d PF: > { %v240_v1 = vld [vmem:[%s1708_s25 + $0x30] sm:$0xff]  ;;  %v241_v2 = vld [vmem:[%s1708_s25 + $0x38] sm:$0xff]  ;;  %s1584_s18 = smov 124   ;;  %v246_v7 = vld [vmem:[%s1708_s25 + $0x60] sm:$0xff]  ;;  %vm351_vm2 = vcmask 1043456   ;;  %vm299_vm3 = vcmask 31744  }
  0x4e   : > { %v236_v3 = vld [vmem:[%s1708_s25 + $0x10] sm:$0xff]  ;;  %v253_v4 = vmax.f32 %v240_v1, %v241_v2  ;;  %v237_v5 = vld [vmem:[%s1708_s25 + $0x18] sm:$0xff]  ;;  %v247_v8 = vld [vmem:[%s1708_s25 + $0x68] sm:$0xff]  ;;  %s1338_s21 = sshll.u32 %s1629_s16, 6  ;;  %s1127_s28 = sshll.u32 %s1719_s17, 4  ;;  %s1128_s28 = int_to_ptr.vmem [resolvable:$true] %s1127_s28 }
  0x4f   : > { %v251_v6 = vmax.f32 %v236_v3, %v237_v5  ;;  %v244_v9 = vld [vmem:[%s1708_s25 + $0x50] sm:$0xff]  ;;  %v245_v10 = vld [vmem:[%s1708_s25 + $0x58] sm:$0xff]  ;;  %v256_v11 = vmax.f32 %v246_v7, %v247_v8  ;;  %v242_v12 = vld [vmem:[%s1708_s25 + $0x40] sm:$0xff]  ;;  %s1126_s27 = scalar_lea.hbm %s1987_s2, %s1338_s21  ;;  %s1115_s30 = scalar_lea.sflag [#allocation5], %s1704_s10 }
  0x50   : > { %272 = vrot.lane.b32.xlu0 %v253_v4, %s1584_s18  ;;  %v243_v13 = vld [vmem:[%s1708_s25 + $0x48] sm:$0xff]  ;;  %v255_v14 = vmax.f32 %v244_v9, %v245_v10  ;;  %v238_v15 = vld [vmem:[%s1708_s25 + $0x20] sm:$0xff]  ;;  %v248_v21 = vld [vmem:[%s1708_s25 + $0x70] sm:$0xff]  ;;  %s1129_s29 = sshll.u32 %s1126_s27, 4  ;;  %s1494_s11 = scalar_lea.hbm %s1987_s2, 128  ;;  %s1130_s29 = int_to_ptr.hbm [resolvable:$true] %s1129_s29 }
  0x51   : > { %268 = vrot.lane.b32.xlu1 %v251_v6, %s1584_s18  ;;  %278 = vrot.lane.b32.xlu2 %v256_v11, %s1584_s18  ;;  %v239_v16 = vld [vmem:[%s1708_s25 + $0x28] sm:$0xff]  ;;  %v254_v17 = vmax.f32 %v242_v12, %v243_v13  ;;  %v234_v19 = vld [vmem:[%s1708_s25] sm:$0xff]  ;;  %v645_v34 = vld [vmem:[#allocation6 + $0x10] sm:$0xf]  ;;  %s1488_s7 = sshra.s32 %s1130_s29, 4  ;;  %s1489_s7 = int_to_ptr.hbm [resolvable:$true] %s1488_s7 }
  0x52   : > { %v252_v18 = vmax.f32 %v238_v15, %v239_v16  ;;  %v235_v20 = vld [vmem:[%s1708_s25 + $0x8] sm:$0xff]  ;;  %v249_v22 = vld [vmem:[%s1708_s25 + $0x78] sm:$0xff]  ;;  %v326_v25 = vld [vmem:[#allocation6 + $0x4] sm:$0xf]  ;;  %s1490_s8 = scalar_lea.hbm %s1489_s7, 64  ;;  %p1495_p9 = scmp.lt.s32.totalorder %s1489_s7, %s1987_s2 }
  0x53   : > { %v250_v23 = vmax.f32 %v234_v19, %v235_v20  ;;  %v1739_v24 = vmax.f32 %v248_v21, %v249_v22  ;;  %1339 = vmatpush.msk.msra.mxu1 %vm351_vm2, %v326_v25  ;;  %1340 = vmatpush.msk.msra.mxu2 %vm351_vm2, %v326_v25  ;;  %v473_v29 = vld [vmem:[#allocation6 + $0x8] sm:$0xf]  ;;  %v559_v32 = vld [vmem:[#allocation6 + $0xc] sm:$0xf]  ;;  %v316_v33 = vld [vmem:[#allocation6] sm:$0xf]  ;;  %p1491_p1 = scmp.ne.s32.totalorder %s1489_s7, %s1490_s8  ;;  %p1496_p12 = scmp.lt.s32.totalorder %s1494_s11, %s1490_s8 }
  0x54   : > { %1249 = vmatpush.msk.msra.mxu0 %vm351_vm2, %v326_v25  ;;  %1341 = vmatpush.msk.msra.mxu3 %vm351_vm2, %v326_v25  ;;  %v317_v30 = vld [vmem:[#allocation2 + $0x1] sm:$0xff]  ;;  %v818_v42 = vld [vmem:[#allocation6 + $0x18] sm:$0xf]  ;;  %v731_v45 = vld [vmem:[#allocation6 + $0x14] sm:$0xf] }
  0x55   : > { %1267 = vmatpush.msk.msrb.mxu2 %vm351_vm2, %v473_v29  ;;  %1250 = vmatmul.msk.f32.vlgmr.msra.gmra.mxu0 %vm299_vm3, %v317_v30  ;;  %v990_v47 = vld [vmem:[#allocation6 + $0x20] sm:$0xf]  ;;  %v904_v52 = vld [vmem:[#allocation6 + $0x1c] sm:$0xf]  ;;  %v816_v16 = vld [vmem:[#allocation2 + $0x90] sm:$0xff]  ;;  %p1492_p4 = pnand %p1491_p1, %p1676_p10  ;;  %p1497_p11 = por %p1496_p12, %p1495_p9 }
  0x56   : > { %1276 = vmatpush.msk.msrb.mxu3 %vm351_vm2, %v559_v32  ;;  %1258 = vmatpush.msk.msrb.mxu1 %vm351_vm2, %v316_v33  ;;  %v308_v54 = vld [vmem:[#allocation2] sm:$0xff]  ;;  %v902_v21 = vld [vmem:[#allocation2 + $0x91] sm:$0xff] }
  0x57   : > { %1285 = vmatpush.msk.msrb.mxu0 %vm351_vm2, %v645_v34  ;;  %v464_v55 = vld [vmem:[#allocation2 + $0x2] sm:$0xff]  ;;  %v988_v22 = vld [vmem:[#allocation2 + $0x92] sm:$0xff]  ;;  %p1493_p8 = pneg %p1492_p4 }
  0x58   : > { %276 = vrot.lane.b32.xlu0 %v255_v14, %s1584_s18 }
  0x59   : > { %274 = vrot.lane.b32.xlu1 %v254_v17, %s1584_s18  ;;  %270 = vrot.lane.b32.xlu2 %v252_v18, %s1584_s18  ;;  %p1498_p13 = pnand %p1497_p11, %p1493_p8 }
  0x5a   : > { %1321 = vmatpush.msk.msra.mxu0 %vm351_vm2, %v990_v47 }
  0x60   : > { %266 = vrot.lane.b32.xlu0 %v250_v23, %s1584_s18 }
  0x61   : > { %280 = vrot.lane.b32.xlu1 %v1739_v24, %s1584_s18 }
  0xab   : > { %v279_v26 = vpop.permute.xlu2 %278 }
  0xac   : > { %v296_v27 = vmax.f32 %v256_v11, %v279_v26 }
  0xae   : > { %306 = vst.msk [vmem:[#allocation2 + $0x71] sm:$0xff] %vm299_vm3, %v296_v27 }
  0xb3   : > { %v271_v28 = vpop.permute.xlu2 %270 }
  0xb4   : > { %v292_v31 = vmax.f32 %v252_v18, %v271_v28 }
  0xb5   : > { %v1782_v57 = vld [vmem:[#allocation2 + $0x71] sm:$0xff] }
  0xb6   : > { %302 = vst.msk [vmem:[#allocation2 + $0x31] sm:$0xff] %vm299_vm3, %v292_v31  ;;  %v315_v8 = vld [vmem:[#allocation2 + $0x70] sm:$0xff] }
  0xb7   : > { %v471_v9 = vld [vmem:[#allocation2 + $0x72] sm:$0xff] }
  0xbd   : > { %v1768_v50 = vld [vmem:[#allocation2 + $0x31] sm:$0xff] }
  0xbe   : > { %v311_v0 = vld [vmem:[#allocation2 + $0x30] sm:$0xff] }
  0xbf   : > { %v467_v1 = vld [vmem:[#allocation2 + $0x32] sm:$0xff] }
  0xc2   : > { %v273_v35 = vpop.permute.xlu0 %272 }
  0xc3   : > { %v293_v36 = vmax.f32 %v253_v4, %v273_v35  ;;  %v269_v37 = vpop.permute.xlu1 %268 }
  0xc4   : > { %v291_v38 = vmax.f32 %v251_v6, %v269_v37 }
  0xc5   : > { %303 = vst.msk [vmem:[#allocation2 + $0x41] sm:$0xff] %vm299_vm3, %v293_v36 }
  0xc6   : > { %301 = vst.msk [vmem:[#allocation2 + $0x21] sm:$0xff] %vm299_vm3, %v291_v38 }
  0xca   : > { %v277_v39 = vpop.permute.xlu0 %276 }
  0xcb   : > { %v295_v40 = vmax.f32 %v255_v14, %v277_v39  ;;  %v275_v41 = vpop.permute.xlu1 %274 }
  0xcc   : > { %v294_v43 = vmax.f32 %v254_v17, %v275_v41  ;;  %v1755_v44 = vld [vmem:[#allocation2 + $0x41] sm:$0xff] }
  0xcd   : > { %305 = vst.msk [vmem:[#allocation2 + $0x61] sm:$0xff] %vm299_vm3, %v295_v40  ;;  %v1758_v46 = vld [vmem:[#allocation2 + $0x21] sm:$0xff]  ;;  %1254 = vmatmul.msk.f32.vlgmr.msra.gmra.mxu2 %vm299_vm3, %v1755_v44 }
  0xce   : > { %304 = vst.msk [vmem:[#allocation2 + $0x51] sm:$0xff] %vm299_vm3, %v294_v43  ;;  %1252 = vmatmul.msk.f32.vlgmr.msra.gmra.mxu1 %vm299_vm3, %v1758_v46  ;;  %1303 = vmatpush.msk.msra.mxu2 %vm351_vm2, %v818_v42  ;;  %v310_v60 = vld [vmem:[#allocation2 + $0x20] sm:$0xff] }
  0xcf   : > { %1294 = vmatpush.msk.msra.mxu1 %vm351_vm2, %v731_v45  ;;  %v466_v61 = vld [vmem:[#allocation2 + $0x22] sm:$0xff] }
  0xd0   : > { %v312_v2 = vld [vmem:[#allocation2 + $0x40] sm:$0xff] }
  0xd1   : > { %v468_v3 = vld [vmem:[#allocation2 + $0x42] sm:$0xff] }
  0xd2   : > { %v267_v48 = vpop.permute.xlu0 %266  ;;  %v372_v14 = vpop.f32.mrf.mxu0 }
  0xd3   : > { %v290_v49 = vmax.f32 %v250_v23, %v267_v48  ;;  %v281_v62 = vpop.permute.xlu1 %280 }
  0xd4   : > { %v1770_v51 = vld [vmem:[#allocation2 + $0x61] sm:$0xff]  ;;  %v297_v63 = vmax.f32 %v1739_v24, %v281_v62 }
  0xd5   : > { %300 = vst.msk [vmem:[#allocation2 + $0x11] sm:$0xff] %vm299_vm3, %v290_v49  ;;  %v1773_v53 = vld [vmem:[#allocation2 + $0x51] sm:$0xff]  ;;  %1256 = vmatmul.msk.f32.vlgmr.msra.gmra.mxu3 %vm299_vm3, %v1770_v51  ;;  %v314_v6 = vld [vmem:[#allocation2 + $0x60] sm:$0xff] }
  0xd6   : > { %1253 = vmatmul.msk.f32.gmra.mxu1 %vm299_vm3, %v1768_v50  ;;  %1255 = vmatmul.msk.f32.gmra.mxu2 %vm299_vm3, %v1773_v53  ;;  %307 = vst.msk [vmem:[#allocation2 + $0x81] sm:$0xff] %vm299_vm3, %v297_v63  ;;  %v313_v4 = vld [vmem:[#allocation2 + $0x50] sm:$0xff]  ;;  %v470_v7 = vld [vmem:[#allocation2 + $0x62] sm:$0xff] }
  0xd7   : > { %1312 = vmatpush.msk.msra.mxu3 %vm351_vm2, %v904_v52  ;;  %v469_v5 = vld [vmem:[#allocation2 + $0x52] sm:$0xff] }
  0xdc   : > { %v318_v56 = vld [vmem:[#allocation2 + $0x11] sm:$0xff] }
  0xdd   : > { %1251 = vmatmul.msk.f32.gmra.mxu0 %vm299_vm3, %v318_v56  ;;  %1257 = vmatmul.msk.f32.gmra.mxu3 %vm299_vm3, %v1782_v57  ;;  %v309_v58 = vld [vmem:[#allocation2 + $0x10] sm:$0xff]  ;;  %v557_v10 = vld [vmem:[#allocation2 + $0x80] sm:$0xff] }
  0xde   : > { %1259 = vmatmul.msk.f32.vlgmr.msrb.gmra.mxu1 %vm299_vm3, %v308_v54  ;;  %1268 = vmatmul.msk.f32.vlgmr.msrb.gmra.mxu2 %vm299_vm3, %v464_v55  ;;  %v465_v59 = vld [vmem:[#allocation2 + $0x12] sm:$0xff]  ;;  %v643_v11 = vld [vmem:[#allocation2 + $0x81] sm:$0xff] }
  0xdf   : > { %v729_v17 = vld [vmem:[#allocation2 + $0x82] sm:$0xff] }
  0xe5   : > { %1277 = vmatmul.msk.f32.vlgmr.msrb.gmra.mxu3 %vm299_vm3, %v309_v58  ;;  %1286 = vmatmul.msk.f32.vlgmr.msrb.gmra.mxu0 %vm299_vm3, %v318_v56 }
  0xe6   : > { %1260 = vmatmul.msk.f32.gmra.mxu1 %vm299_vm3, %v309_v58  ;;  %1269 = vmatmul.msk.f32.gmra.mxu2 %vm299_vm3, %v465_v59 }
  0xed   : > { %1278 = vmatmul.msk.f32.gmra.mxu3 %vm299_vm3, %v310_v60  ;;  %1287 = vmatmul.msk.f32.gmra.mxu0 %vm299_vm3, %v1758_v46 }
  0xee   : > { %1261 = vmatmul.msk.f32.gmra.mxu1 %vm299_vm3, %v310_v60  ;;  %1270 = vmatmul.msk.f32.gmra.mxu2 %vm299_vm3, %v466_v61 }
  0xf5   : > { %1279 = vmatmul.msk.f32.gmra.mxu3 %vm299_vm3, %v311_v0  ;;  %1288 = vmatmul.msk.f32.gmra.mxu0 %vm299_vm3, %v1768_v50 }
  0xf6   : > { %1262 = vmatmul.msk.f32.gmra.mxu1 %vm299_vm3, %v311_v0  ;;  %1271 = vmatmul.msk.f32.gmra.mxu2 %vm299_vm3, %v467_v1 }
  0xfd   : > { %1280 = vmatmul.msk.f32.gmra.mxu3 %vm299_vm3, %v312_v2  ;;  %1289 = vmatmul.msk.f32.gmra.mxu0 %vm299_vm3, %v1755_v44 }
  0xfe   : > { %1263 = vmatmul.msk.f32.gmra.mxu1 %vm299_vm3, %v312_v2  ;;  %1272 = vmatmul.msk.f32.gmra.mxu2 %vm299_vm3, %v468_v3 }
 0x105   : > { %1281 = vmatmul.msk.f32.gmra.mxu3 %vm299_vm3, %v313_v4  ;;  %1290 = vmatmul.msk.f32.gmra.mxu0 %vm299_vm3, %v1773_v53 }
 0x106   : > { %1264 = vmatmul.msk.f32.gmra.mxu1 %vm299_vm3, %v313_v4  ;;  %1273 = vmatmul.msk.f32.gmra.mxu2 %vm299_vm3, %v469_v5 }
 0x10d   : > { %1282 = vmatmul.msk.f32.gmra.mxu3 %vm299_vm3, %v314_v6  ;;  %1291 = vmatmul.msk.f32.gmra.mxu0 %vm299_vm3, %v1770_v51 }
 0x10e   : > { %1265 = vmatmul.msk.f32.gmra.mxu1 %vm299_vm3, %v314_v6  ;;  %1274 = vmatmul.msk.f32.gmra.mxu2 %vm299_vm3, %v470_v7 }
 0x115   : > { %1283 = vmatmul.msk.f32.gmra.mxu3 %vm299_vm3, %v315_v8  ;;  %1292 = vmatmul.msk.f32.gmra.mxu0 %vm299_vm3, %v1782_v57 }
 0x116   : > { %1266 = vmatmul.msk.f32.gmra.mxu1 %vm299_vm3, %v315_v8  ;;  %1275 = vmatmul.msk.f32.gmra.mxu2 %vm299_vm3, %v471_v9 }
 0x11d   : > { %1284 = vmatmul.msk.f32.gmra.mxu3 %vm299_vm3, %v557_v10  ;;  %1293 = vmatmul.msk.f32.gmra.mxu0 %vm299_vm3, %v643_v11 }
 0x11e   : > { %1295 = vmatmul.msk.f32.vlgmr.msra.gmra.mxu1 %vm299_vm3, %v465_v59  ;;  %1304 = vmatmul.msk.f32.vlgmr.msra.gmra.mxu2 %vm299_vm3, %v310_v60 }
 0x125   : > { %1313 = vmatmul.msk.f32.vlgmr.msra.gmra.mxu3 %vm299_vm3, %v1758_v46  ;;  %1322 = vmatmul.msk.f32.vlgmr.msra.gmra.mxu0 %vm299_vm3, %v466_v61 }
 0x126   : > { %1296 = vmatmul.msk.f32.gmra.mxu1 %vm299_vm3, %v466_v61  ;;  %1305 = vmatmul.msk.f32.gmra.mxu2 %vm299_vm3, %v311_v0 }
 0x12d   : > { %1314 = vmatmul.msk.f32.gmra.mxu3 %vm299_vm3, %v1768_v50  ;;  %1323 = vmatmul.msk.f32.gmra.mxu0 %vm299_vm3, %v467_v1 }
 0x12e   : > { %1297 = vmatmul.msk.f32.gmra.mxu1 %vm299_vm3, %v467_v1  ;;  %1306 = vmatmul.msk.f32.gmra.mxu2 %vm299_vm3, %v312_v2 }
 0x135   : > { %1315 = vmatmul.msk.f32.gmra.mxu3 %vm299_vm3, %v1755_v44  ;;  %1324 = vmatmul.msk.f32.gmra.mxu0 %vm299_vm3, %v468_v3 }
 0x136   : > { %1298 = vmatmul.msk.f32.gmra.mxu1 %vm299_vm3, %v468_v3  ;;  %1307 = vmatmul.msk.f32.gmra.mxu2 %vm299_vm3, %v313_v4 }
 0x13d   : > { %1316 = vmatmul.msk.f32.gmra.mxu3 %vm299_vm3, %v1773_v53  ;;  %1325 = vmatmul.msk.f32.gmra.mxu0 %vm299_vm3, %v469_v5 }
 0x13e   : > { %1299 = vmatmul.msk.f32.gmra.mxu1 %vm299_vm3, %v469_v5  ;;  %1308 = vmatmul.msk.f32.gmra.mxu2 %vm299_vm3, %v314_v6 }
 0x145   : > { %1317 = vmatmul.msk.f32.gmra.mxu3 %vm299_vm3, %v1770_v51  ;;  %1326 = vmatmul.msk.f32.gmra.mxu0 %vm299_vm3, %v470_v7 }
 0x146   : > { %1300 = vmatmul.msk.f32.gmra.mxu1 %vm299_vm3, %v470_v7  ;;  %1309 = vmatmul.msk.f32.gmra.mxu2 %vm299_vm3, %v315_v8 }
 0x14b   : > { %v1854_v12 = vpop.f32.mrf.mxu1 }
 0x14d   : > { %1318 = vmatmul.msk.f32.gmra.mxu3 %vm299_vm3, %v1782_v57  ;;  %1327 = vmatmul.msk.f32.gmra.mxu0 %vm299_vm3, %v471_v9 }
 0x14e   : > { %1301 = vmatmul.msk.f32.gmra.mxu1 %vm299_vm3, %v471_v9  ;;  %1310 = vmatmul.msk.f32.gmra.mxu2 %vm299_vm3, %v557_v10 }
 0x150   : > { %v1861_v13 = vpop.f32.mrf.mxu2 }
 0x153   : > { %v1863_v15 = vpop.f32.mrf.mxu1 }
 0x155   : > { %1319 = vmatmul.msk.f32.gmra.mxu3 %vm299_vm3, %v643_v11  ;;  %1328 = vmatmul.msk.f32.gmra.mxu0 %vm299_vm3, %v729_v17 }
 0x156   : > { %1302 = vmatmul.msk.f32.gmra.mxu1 %vm299_vm3, %v729_v17  ;;  %1311 = vmatmul.msk.f32.gmra.mxu2 %vm299_vm3, %v816_v16 }
 0x158   : > { %v1869_v18 = vpop.f32.mrf.mxu3 }
 0x159   : > { %v1871_v19 = vpop.f32.mrf.mxu2 }
 0x15a   : > { %v375_v20 = vpop.f32.mrf.mxu0 }
 0x15b   : > { %v440_v23 = vpop.f32.mrf.mxu1 }
 0x15c   : > { %v441_v55 = vadd.f32 %v440_v23, %v372_v14 }
 0x15d   : > { %1320 = vmatmul.msk.f32.gmra.mxu3 %vm299_vm3, %v902_v21  ;;  %1329 = vmatmul.msk.f32.gmra.mxu0 %vm299_vm3, %v988_v22 }
 0x160   : > { %v1875_v24 = vpop.f32.mrf.mxu3 }
 0x161   : > { %v518_v25 = vpop.f32.mrf.mxu2 }
 0x162   : > { %v690_v26 = vpop.f32.mrf.mxu0  ;;  %v542_v57 = vadd.f32 %v518_v25, %v441_v55 }
 0x163   : > { %v443_v27 = vpop.f32.mrf.mxu1 }
 0x164   : > { %v444_v62 = vadd.f32 %v443_v27, %v375_v20 }
 0x168   : > { %v604_v28 = vpop.f32.mrf.mxu3 }
 0x169   : > { %v521_v29 = vpop.f32.mrf.mxu2  ;;  %v628_v58 = vadd.f32 %v604_v28, %v542_v57 }
 0x16a   : > { %v693_v30 = vpop.f32.mrf.mxu0  ;;  %v543_v1 = vadd.f32 %v521_v29, %v444_v62 }
 0x16b   : > { %v446_v31 = vpop.f32.mrf.mxu1  ;;  %v714_v63 = vadd.f32 %v690_v26, %v628_v58 }
 0x16c   : > { %v447_v9 = vadd.f32 %v446_v31, %v1854_v12 }
 0x170   : > { %v607_v32 = vpop.f32.mrf.mxu3 }
 0x171   : > { %v524_v33 = vpop.f32.mrf.mxu2  ;;  %v629_v3 = vadd.f32 %v607_v32, %v543_v1 }
 0x172   : > { %v696_v34 = vpop.f32.mrf.mxu0  ;;  %v544_v16 = vadd.f32 %v524_v33, %v447_v9 }
 0x173   : > { %v449_v35 = vpop.f32.mrf.mxu1  ;;  %v715_v10 = vadd.f32 %v693_v30, %v629_v3 }
 0x174   : > { %v450_v26 = vadd.f32 %v449_v35, %v1863_v15 }
 0x178   : > { %v610_v36 = vpop.f32.mrf.mxu3 }
 0x179   : > { %v527_v37 = vpop.f32.mrf.mxu2  ;;  %v630_v20 = vadd.f32 %v610_v36, %v544_v16 }
 0x17a   : > { %v1877_v38 = vpop.f32.mrf.mxu0  ;;  %v545_v55 = vadd.f32 %v527_v37, %v450_v26 }
 0x17b   : > { %v1879_v39 = vpop.f32.mrf.mxu1  ;;  %v716_v28 = vadd.f32 %v696_v34, %v630_v20 }
 0x17c   : > { %v453_v15 = vadd.f32 %v1879_v39, %v1861_v13 }
 0x180   : > { %v613_v40 = vpop.f32.mrf.mxu3 }
 0x181   : > { %v1881_v41 = vpop.f32.mrf.mxu2 }
 0x182   : > { %v1883_v42 = vpop.f32.mrf.mxu0 }
 0x183   : > { %v1885_v43 = vpop.f32.mrf.mxu1 }
 0x184   : > { %v456_v13 = vadd.f32 %v1885_v43, %v1871_v19 }
 0x188   : > { %v1887_v44 = vpop.f32.mrf.mxu3 }
 0x189   : > { %v1889_v45 = vpop.f32.mrf.mxu2 }
 0x18a   : > { %v1891_v46 = vpop.f32.mrf.mxu0 }
 0x18b   : > { %v1893_v47 = vpop.f32.mrf.mxu1 }
 0x18c   : > { %v459_v19 = vadd.f32 %v1893_v47, %v1869_v18 }
 0x190   : > { %v1895_v48 = vpop.f32.mrf.mxu3 }
 0x191   : > { %v1897_v49 = vpop.f32.mrf.mxu2 }
 0x192   : > { %v1899_v50 = vpop.f32.mrf.mxu0 }
 0x193   : > { %v1901_v51 = vpop.f32.mrf.mxu1 }
 0x198   : > { %v1903_v52 = vpop.f32.mrf.mxu3 }
 0x199   : > { %v1905_v53 = vpop.f32.mrf.mxu2 }
 0x19a   : > { %v1907_v54 = vpop.f32.mrf.mxu0 }
 0x19b   : > { %v776_v56 = vpop.f32.mrf.mxu1 }
 0x19c   : > { %v800_v2 = vadd.f32 %v776_v56, %v714_v63  ;;  %v631_v56 = vadd.f32 %v613_v40, %v545_v55  ;;  %v546_v63 = vadd.f32 %v1881_v41, %v453_v15  ;;  %v547_v41 = vadd.f32 %v1889_v45, %v456_v13 }
 0x19d   : > { %v548_v45 = vadd.f32 %v1897_v49, %v459_v19 }
 0x19e   : > { %v717_v34 = vadd.f32 %v1877_v38, %v631_v56 }
 0x1a0   : > { %v1909_v59 = vpop.f32.mrf.mxu3 }
 0x1a1   : > { %v863_v60 = vpop.f32.mrf.mxu2 }
 0x1a2   : > { %v1035_v61 = vpop.f32.mrf.mxu0  ;;  %v887_v4 = vadd.f32 %v863_v60, %v800_v2  ;;  %v632_v2 = vadd.f32 %v1887_v44, %v546_v63 }
 0x1a3   : > { %v779_v0 = vpop.f32.mrf.mxu1 }
 0x1a4   : > { %v801_v17 = vadd.f32 %v779_v0, %v715_v10  ;;  %v718_v38 = vadd.f32 %v1883_v42, %v632_v2 }
 0x1a8   : > { %v949_v5 = vpop.f32.mrf.mxu3 }
 0x1a9   : > { %v866_v6 = vpop.f32.mrf.mxu2  ;;  %v973_v7 = vadd.f32 %v949_v5, %v887_v4 }
 0x1aa   : > { %v1038_v8 = vpop.f32.mrf.mxu0  ;;  %v888_v21 = vadd.f32 %v866_v6, %v801_v17 }
 0x1ab   : > { %v1059_v11 = vadd.f32 %v1035_v61, %v973_v7  ;;  %v782_v14 = vpop.f32.mrf.mxu1 }
 0x1ac   : > { %v802_v30 = vadd.f32 %v782_v14, %v716_v28  ;;  %v633_v14 = vadd.f32 %v1895_v48, %v547_v41  ;;  %v634_v48 = vadd.f32 %v1903_v52, %v548_v45 }
 0x1ad   : > { %1067 = vst [vmem:[%s1719_s17] sm:$0xff] %v1059_v11  ;;  %v1089_v12 = vmul.f32 %v1059_v11, %v1059_v11 }
 0x1ae   : > { %v719_v42 = vadd.f32 %v1891_v46, %v633_v14  ;;  %v462_v46 = vadd.f32 %v1901_v51, %v1875_v24  ;;  %v720_v47 = vadd.f32 %v1899_v50, %v634_v48 }
 0x1b0   : > { %v952_v22 = vpop.f32.mrf.mxu3 }
 0x1b1   : > { %v869_v23 = vpop.f32.mrf.mxu2  ;;  %v974_v25 = vadd.f32 %v952_v22, %v888_v21 }
 0x1b2   : > { %v1041_v27 = vpop.f32.mrf.mxu0  ;;  %v889_v57 = vadd.f32 %v869_v23, %v802_v30  ;;  %v549_v30 = vadd.f32 %v1905_v53, %v462_v46 }
 0x1b3   : > { %v1060_v29 = vadd.f32 %v1038_v8, %v974_v25  ;;  %v785_v32 = vpop.f32.mrf.mxu1 }
 0x1b4   : > { %v803_v0 = vadd.f32 %v785_v32, %v717_v34  ;;  %v635_v56 = vadd.f32 %v1909_v59, %v549_v30 }
 0x1b5   : > { %1068 = vst [vmem:[%s1719_s17 + $0x8] sm:$0xff] %v1060_v29  ;;  %v1076_v31 = vadd.f32 %v1060_v29, %v1059_v11  ;;  %v1090_v33 = vmul.f32 %v1060_v29, %v1060_v29 }
 0x1b6   : > { %v721_v50 = vadd.f32 %v1907_v54, %v635_v56 }
 0x1b7   : > { %v1097_v36 = vadd.f32 %v1090_v33, %v1089_v12 }
 0x1b8   : > { %v955_v58 = vpop.f32.mrf.mxu3 }
 0x1b9   : > { %v872_v60 = vpop.f32.mrf.mxu2  ;;  %v975_v61 = vadd.f32 %v955_v58, %v889_v57 }
 0x1ba   : > { %v1044_v62 = vpop.f32.mrf.mxu0  ;;  %v890_v3 = vadd.f32 %v872_v60, %v803_v0 }
 0x1bb   : > { %v1061_v35 = vadd.f32 %v1041_v27, %v975_v61  ;;  %v788_v37 = vpop.f32.mrf.mxu1 }
 0x1bc   : > { %v804_v9 = vadd.f32 %v788_v37, %v718_v38 }
 0x1bd   : > { %1069 = vst [vmem:[%s1719_s17 + $0x10] sm:$0xff] %v1061_v35  ;;  %v1077_v1 = vadd.f32 %v1076_v31, %v1061_v35  ;;  %v1091_v40 = vmul.f32 %v1061_v35, %v1061_v35 }
 0x1bf   : > { %v1098_v4 = vadd.f32 %v1097_v36, %v1091_v40 }
 0x1c0   : > { %v958_v5 = vpop.f32.mrf.mxu3 }
 0x1c1   : > { %v875_v6 = vpop.f32.mrf.mxu2  ;;  %v976_v7 = vadd.f32 %v958_v5, %v890_v3 }
 0x1c2   : > { %v1047_v8 = vpop.f32.mrf.mxu0  ;;  %v891_v16 = vadd.f32 %v875_v6, %v804_v9 }
 0x1c3   : > { %v1062_v39 = vadd.f32 %v1044_v62, %v976_v7  ;;  %v791_v44 = vpop.f32.mrf.mxu1 }
 0x1c4   : > { %v805_v23 = vadd.f32 %v791_v44, %v719_v42 }
 0x1c5   : > { %1070 = vst [vmem:[%s1719_s17 + $0x18] sm:$0xff] %v1062_v39  ;;  %v1078_v10 = vadd.f32 %v1077_v1, %v1062_v39  ;;  %v1092_v11 = vmul.f32 %v1062_v39, %v1062_v39 }
 0x1c7   : > { %v1099_v17 = vadd.f32 %v1098_v4, %v1092_v11 }
 0x1c8   : > { %v961_v20 = vpop.f32.mrf.mxu3 }
 0x1c9   : > { %v878_v21 = vpop.f32.mrf.mxu2  ;;  %v977_v22 = vadd.f32 %v961_v20, %v891_v16 }
 0x1ca   : > { %v1050_v27 = vpop.f32.mrf.mxu0  ;;  %v892_v28 = vadd.f32 %v878_v21, %v805_v23 }
 0x1cb   : > { %v1063_v43 = vadd.f32 %v1047_v8, %v977_v22  ;;  %v794_v32 = vpop.f32.mrf.mxu1 }
 0x1cc   : > { %v806_v31 = vadd.f32 %v794_v32, %v720_v47 }
 0x1cd   : > { %1071 = vst [vmem:[%s1719_s17 + $0x20] sm:$0xff] %v1063_v43  ;;  %v1079_v25 = vadd.f32 %v1078_v10, %v1063_v43  ;;  %v1093_v26 = vmul.f32 %v1063_v43, %v1063_v43 }
 0x1cf   : > { %v1100_v29 = vadd.f32 %v1099_v17, %v1093_v26 }
 0x1d0   : > { %v964_v55 = vpop.f32.mrf.mxu3 }
 0x1d1   : > { %v978_v12 = vadd.f32 %v964_v55, %v892_v28  ;;  %v881_v18 = vpop.f32.mrf.mxu2 }
 0x1d2   : > { %v893_v57 = vadd.f32 %v881_v18, %v806_v31  ;;  %v1053_v58 = vpop.f32.mrf.mxu0 }
 0x1d3   : > { %v1064_v49 = vadd.f32 %v1050_v27, %v978_v12  ;;  %v797_v24 = vpop.f32.mrf.mxu1 }
 0x1d4   : > { %v807_v53 = vadd.f32 %v797_v24, %v721_v50 }
 0x1d5   : > { %1072 = vst [vmem:[%s1719_s17 + $0x28] sm:$0xff] %v1064_v49  ;;  %v1080_v33 = vadd.f32 %v1079_v25, %v1064_v49  ;;  %v1094_v52 = vmul.f32 %v1064_v49, %v1064_v49 }
 0x1d7   : > { %v1101_v36 = vadd.f32 %v1100_v29, %v1094_v52 }
 0x1d8   : > { %v967_v60 = vpop.f32.mrf.mxu3 }
 0x1d9   : > { %v979_v61 = vadd.f32 %v967_v60, %v893_v57  ;;  %v884_v62 = vpop.f32.mrf.mxu2 }
 0x1da   : > { %v894_v34 = vadd.f32 %v884_v62, %v807_v53  ;;  %v1056_v63 = vpop.f32.mrf.mxu0 }
 0x1db   : > { %v1065_v51 = vadd.f32 %v1053_v58, %v979_v61 }
 0x1dd   : > { %1073 = vst [vmem:[%s1719_s17 + $0x30] sm:$0xff] %v1065_v51  ;;  %v1095_v59 = vmul.f32 %v1065_v51, %v1065_v51  ;;  %v1081_v15 = vadd.f32 %v1080_v33, %v1065_v51 }
 0x1df   : > { %v1102_v35 = vadd.f32 %v1101_v36, %v1095_v59 }
 0x1e0   : > { %v970_v37 = vpop.f32.mrf.mxu3 }
 0x1e1   : > { %v980_v54 = vadd.f32 %v970_v37, %v894_v34 }
 0x1e3   : > { %v1066_v0 = vadd.f32 %v1056_v63, %v980_v54 }
 0x1e5   : > { %1074 = vst [vmem:[%s1719_s17 + $0x38] sm:$0xff] %v1066_v0  ;;  %v1082_v1 = vadd.f32 %v1081_v15, %v1066_v0  ;;  %v1096_v40 = vmul.f32 %v1066_v0, %v1066_v0 }
 0x1e6   : > { %1501 = shalt.err (!%p1498_p13)
}
 0x1e7   : > { %s1585_s10 = smov 128   ;;  %s1586_s23 = smov 8   ;;  %v1083_v2 = vrot.slane %v1082_v1, 4  ;;  %v1103_v3 = vadd.f32 %v1102_v35, %v1096_v40  ;;  %vm1110_vm4 = vcmask 1040384   ;;  %v1075_v9 = vld [vmem:[#allocation9] sm:$0x3] }
 0x1e8   : > { %1348 = dma.vmem_to_hbm [thread:$0]  (%p1676_p10), %s1128_s28, 1024, %s1130_s29, %s1115_s30, %s1585_s10, %s1585_s10, %s1586_s23  }
 0x1e9   : > { %v1084_v4 = vadd.f32 %v1083_v2, %v1082_v1  ;;  %v1104_v5 = vrot.slane %v1103_v3, 4  ;;  %s1587_s17 = smov [#allocation9]   ;;  %s1144_s22 = sshll.u32 %s1988_s3, 4  ;;  %s1145_s22 = int_to_ptr.hbm [resolvable:$true] %s1144_s22 }
 0x1ea   : > { %s1142_s5 = sshll.u32 %s1587_s17, 4  ;;  %p1996_p10 = scmp.eq.s32.totalorder %s1629_s16, 1  ;;  %s1143_s5 = int_to_ptr.vmem [resolvable:$true] %s1142_s5 }
 0x1eb   : > { %v1085_v6 = vrot.slane %v1084_v4, 2  ;;  %v1105_v7 = vadd.f32 %v1104_v5, %v1103_v3 }
 0x1ec   : > { %p1997_p0 = pmov %p1996_p10 }
 0x1ed   : > { %v1086_v13 = vadd.f32 %v1085_v6, %v1084_v4  ;;  %v1106_v38 = vrot.slane %v1105_v7, 2 }
 0x1ef   : > { %v1087_v39 = vrot.slane %v1086_v13, 1  ;;  %v1107_v8 = vadd.f32 %v1106_v38, %v1105_v7 }
 0x1f1   : > { %v1108_v41 = vrot.slane %v1107_v8, 1  ;;  %v1088_v10 = vadd.f32 %v1087_v39, %v1086_v13 }
 0x1f3   : > { %v1109_v11 = vadd.f32 %v1108_v41, %v1107_v8 }
 0x1f5   : > { %v1111_v44 = vsel %vm1110_vm4, %v1088_v10, %v1109_v11 }
 0x1f6   : > { %v1112_v14 = vadd.f32 %v1111_v44, %v1075_v9 }
 0x1f8   : > { %1113 = vst [vmem:[#allocation9] sm:$0x3] %v1112_v14 }
 0x1f9   : > { %1350 = dma.vmem_to_hbm [thread:$0]  (%p1996_p10), %s1143_s5, 32, %s1145_s22, [#allocation10]  }
 0x1fa   : > { %1555 = dma.done.wait (%p1997_p0), [#allocation10], 32   ;;  %p1998_p3 = pmov %p1997_p0 }
 0x1fc   : > { %1557 = vsyncadd (%p1998_p3), [#allocation10], 4294967264 }
 0x1fd PF: > { %s1161_s24 = sand.u32 1, %s1564_s12   ;;  %p1999_p5 = scmp.ge.s32.totalorder %s1576_s15, 2 }
 0x1fe   : > { %s1162_s27 = scalar_lea.sflag [#allocation5], %s1161_s24 }
 0x1ff   : > { %p1363_p7 = pnand %p1999_p5, %p1643_p6 }
 0x201   : > { %p1364_p2 = pneg %p1363_p7 }
 0x203   : > { %1559 = dma.done.wait (%p1364_p2), %s1162_s27, 1024  }
 0x204   : > { %1561 = vsyncadd (%p1364_p2), %s1162_s27, 4294966272  ;;  %p19_p1 = scmp.ge.s32.totalorder %s1662_s26, 4   ;;  %s2000_s12 = smov %s1568_s13 }
 0x205   : > { %s2001_s13 = smov %s1572_s14  ;;  %s2002_s14 = smov %s1672_s4 }
 0x206   : > { %s2003_s15 = smov %s1662_s26  ;;  %21 = sbr.rel (!%p19_p1) target bundleno = 7 (0x7), region = 99 }
 0x20b   :  { %1168 = vsyncpa [#allocation4], 1 }
 0x20c   :  { %1170 = vsyncpa [#allocation4 + $0x1], 1 }
 0x20d   :  { %1171 = vsyncpa [#allocation7], 1 }
 0x20e   :  { %1172 = vsyncpa [#allocation5], 1 }
 0x20f   :  { %1174 = vsyncpa [#allocation5 + $0x1], 1 }
 0x210   :  { %1175 = vsyncpa [#allocation10], 1 }

</bundles_post_ra>
